<compile_context>
chip_gen: v6e
topology: v6e:2x2x1
jax: 0.10.0
libtpu: 0.0.40
codegen_flags: <defaults>
</compile_context>

<pallas_src>
import functools

import jax
import jax.numpy as jnp
from jax.experimental import pallas as pl
from jax.experimental.pallas import tpu as pltpu

EPS = 1e-5  # nn.InstanceNorm2d default eps (affine=False, biased variance)


# ---------------- in-kernel helpers (traced inside the Pallas body) -----------

def _shift_rows_reflect(a, H, W):
    """a: (C, H*W) lane-dense image. Returns (row y-1, row y+1) arrays with
    reflect padding at the top/bottom edges, built from contiguous lane-axis
    slices (no per-lane selects needed for the vertical direction)."""
    S = H * W
    up = jnp.concatenate([a[:, W:2 * W], a[:, :S - W]], axis=1)       # value at (y-1, x)
    dn = jnp.concatenate([a[:, W:], a[:, S - 2 * W:S - W]], axis=1)   # value at (y+1, x)
    return up, dn


def _conv3x3_acc(a, w_ref, col_masks, H, W):
    """3x3 'same' convolution with reflect padding as 9 accumulated MXU matmuls.

    a:        (Cin, S) in the MXU operand dtype (bf16 or f32).
    w_ref:    (9, Cout, Cin) Ref, tap index k = ky*3 + kx.
    col_masks: (x==0, x==W-1) boolean (1, S) masks (hoisted by the caller).

    Accumulation is f32; no (9*Cin, S) im2col buffer is ever materialized --
    only a few (C, S) temporaries are live at a time.
    """
    lft, rgt = col_masks
    v_m1, v_p1 = _shift_rows_reflect(a, H, W)

    acc = None
    for ky, v in enumerate((v_m1, a, v_p1)):               # ky = 0, 1, 2
        t_l = jnp.roll(v, 1, axis=1)                       # value at (., x-1) (wraps at x==0)
        t_r = jnp.roll(v, -1, axis=1)                      # value at (., x+1) (wraps at x==W-1)
        taps = (jnp.where(lft, t_r, t_l),                  # kx = 0: x-1, reflected at left edge
                v,                                         # kx = 1: x
                jnp.where(rgt, t_l, t_r))                  # kx = 2: x+1, reflected at right edge
        for kx, t in enumerate(taps):
            part = jnp.dot(w_ref[ky * 3 + kx], t,
                           preferred_element_type=jnp.float32)   # (Cout, S) f32
            acc = part if acc is None else acc + part
    return acc


def _instance_norm(y):
    """Per-channel normalization over the spatial (lane) axis.
    Two-pass (y - mean)^2 variance for robustness; biased variance, f32."""
    inv_s = 1.0 / y.shape[-1]
    mean = jnp.sum(y, axis=-1, keepdims=True) * inv_s
    c = y - mean
    var = jnp.sum(c * c, axis=-1, keepdims=True) * inv_s
    return c * jax.lax.rsqrt(var + EPS)


# ---------------------------- Pallas kernel body ------------------------------

def residual_block_kernel(x_ref, w1_ref, w2_ref, o_ref, *, H, W, dot_dtype):
    S = H * W
    # Column-edge masks built ONCE per grid step and shared by both convs.
    xx = jax.lax.broadcasted_iota(jnp.int32, (1, S), 1) % W
    col_masks = (xx == 0, xx == W - 1)

    x = x_ref[0].astype(jnp.float32)                            # (C, S) f32, kept for residual
    h = _conv3x3_acc(x.astype(dot_dtype), w1_ref, col_masks, H, W)   # conv1 (bias cancelled by IN)
    h = jnp.maximum(_instance_norm(h), 0.0)                     # InstanceNorm + ReLU (f32)
    h = _conv3x3_acc(h.astype(dot_dtype), w2_ref, col_masks, H, W)   # conv2
    h = _instance_norm(h)                                       # InstanceNorm (f32)
    o_ref[0] = (x + h).astype(o_ref.dtype)                      # residual add, lane-dense store


# ------------------------------- wrapper --------------------------------------

def _vmem_limit_bytes(C, S, dot_bytes):
    io = 2 * (2 * C * S * 4)                   # double-buffered f32 input + output blocks
    wts = 2 * (2 * 9 * C * C * dot_bytes)      # double-buffered weight blocks
    work = 8 * C * S * 4                       # activations / taps / accumulator headroom
    need = io + wts + work + (4 << 20)
    # >= 32 MiB (raise the small scoped defaults), <= 56 MiB (safe on v7x's 64 MiB VMEM).
    return int(min(max(need, 32 << 20), 56 << 20))


def residual_block(x_nchw, w1, b1, w2, b2, *, compute_dtype=jnp.bfloat16):
    """x_nchw: (N, C, H, W) f32; w*: (C, C, 3, 3) OIHW; b*: (C,).

    Biases are intentionally ignored: InstanceNorm(affine=False) immediately
    follows each conv and subtracts the per-channel mean, so a per-channel bias
    cancels exactly.  (This elision is only valid for this exact layer order.)
    """
    del b1, b2
    N, C, H, W = x_nchw.shape
    assert H >= 2 and W >= 2, "reflect padding of 1 requires H >= 2 and W >= 2"
    S = H * W

    x = x_nchw.reshape(N, C, S)                # contiguous reshape, no transpose
    # OIHW -> (9, Cout, Cin) with tap index k = ky*3 + kx (matches the in-kernel tap order).
    w1t = jnp.transpose(w1, (2, 3, 0, 1)).reshape(9, C, C).astype(compute_dtype)
    w2t = jnp.transpose(w2, (2, 3, 0, 1)).reshape(9, C, C).astype(compute_dtype)

    kernel = functools.partial(residual_block_kernel, H=H, W=W, dot_dtype=compute_dtype)
    out = pl.pallas_call(
        kernel,
        out_shape=jax.ShapeDtypeStruct((N, C, S), x_nchw.dtype),
        grid_spec=pltpu.PrefetchScalarGridSpec(
            num_scalar_prefetch=0,
            grid=(N,),                                   # one image per grid step
            in_specs=[
                pl.BlockSpec((1, C, S), lambda n: (n, 0, 0)),
                pl.BlockSpec((9, C, C), lambda n: (0, 0, 0)),
                pl.BlockSpec((9, C, C), lambda n: (0, 0, 0)),
            ],
            out_specs=pl.BlockSpec((1, C, S), lambda n: (n, 0, 0)),
        ),
        compiler_params=pltpu.CompilerParams(
            dimension_semantics=("parallel",),
            vmem_limit_bytes=_vmem_limit_bytes(C, S, jnp.dtype(compute_dtype).itemsize)),
    )(x, w1t, w2t)

    return out.reshape(N, C, H, W)


# ------------------------- pure-JAX reference (check) -------------------------

def residual_block_ref(x, w1, b1, w2, b2, conv_dtype=jnp.float32):
    def conv(a, w, b):
        ap = jnp.pad(a, ((0, 0), (0, 0), (1, 1), (1, 1)), mode="reflect")
        y = jax.lax.conv_general_dilated(
            ap.astype(conv_dtype), w.astype(conv_dtype),
            window_strides=(1, 1), padding="VALID",
            dimension_numbers=("NCHW", "OIHW", "NCHW"),
            preferred_element_type=jnp.float32)
        return y + b.reshape(1, -1, 1, 1)

    def inorm(a):
        m = jnp.mean(a, axis=(2, 3), keepdims=True)
        v = jnp.mean((a - m) ** 2, axis=(2, 3), keepdims=True)
        return (a - m) / jnp.sqrt(v + EPS)

    h = jnp.maximum(inorm(conv(x, w1, b1)), 0.0)
    h = inorm(conv(h, w2, b2))
    return x + h


# --------------------------------- main ----------------------------------------

if __name__ == "__main__":
    N, C, H, W = 2, 4, 16, 16
    key = jax.random.PRNGKey(0)
    kx, k1, kb1, k2, kb2 = jax.random.split(key, 5)

    x = jax.random.normal(kx, (N, C, H, W), dtype=jnp.float32)
    # Deterministic synthetic parameters (shapes per nn.Conv2d(C, C, 3)).
    w1 = jax.random.normal(k1, (C, C, 3, 3), dtype=jnp.float32) * 0.1
    b1 = jax.random.normal(kb1, (C,), dtype=jnp.float32) * 0.1
    w2 = jax.random.normal(k2, (C, C, 3, 3), dtype=jnp.float32) * 0.1
    b2 = jax.random.normal(kb2, (C,), dtype=jnp.float32) * 0.1

    # Fast path: bf16 MXU operands / neighbourhood, f32 accumulation & elementwise.
    out_bf16 = jax.block_until_ready(residual_block(x, w1, b1, w2, b2))
    # f32-operand path for a tight structural correctness check.
    out_f32 = jax.block_until_ready(
        residual_block(x, w1, b1, w2, b2, compute_dtype=jnp.float32))

    ref_f32 = jax.block_until_ready(residual_block_ref(x, w1, b1, w2, b2))
    ref_bf16 = jax.block_until_ready(
        residual_block_ref(x, w1, b1, w2, b2, conv_dtype=jnp.bfloat16))

    assert out_bf16.shape == (N, C, H, W)
    err_f32 = jnp.max(jnp.abs(out_f32 - ref_f32))
    assert jnp.allclose(out_f32, ref_f32, atol=1e-4, rtol=1e-4), (
        f"f32 path max abs err = {err_f32}")
    err_bf16 = jnp.max(jnp.abs(out_bf16 - ref_bf16))
    assert jnp.allclose(out_bf16, ref_bf16, atol=5e-3, rtol=5e-3), (
        f"bf16 path max abs err = {err_bf16}")

    print("KERNEL_OK")
</pallas_src>

<mosaic_0001>
module attributes {stable_mosaic.version = 11 : i64} {
  func.func @residual_block_kernel(%arg0: i32, %arg1: memref<1x4x256xf32, #tpu.memory_space<vmem>>, %arg2: memref<9x4x4xbf16, #tpu.memory_space<vmem>>, %arg3: memref<9x4x4xbf16, #tpu.memory_space<vmem>>, %arg4: memref<1x4x256xf32, #tpu.memory_space<vmem>>) attributes {dimension_semantics = [#tpu.dimension_semantics<parallel>], iteration_bounds = array<i64: 2>, scalar_prefetch = 0 : i64, scratch_operands = 0 : i64, tpu.core_type = #tpu.core_type<tc>, window_params = [{transform_indices = @transform_0, window_bounds = array<i64: 1, 4, 256>}, {pipeline_mode = #tpu.pipeline_mode<synchronous>, transform_indices = @transform_1, window_bounds = array<i64: 9, 4, 4>}, {pipeline_mode = #tpu.pipeline_mode<synchronous>, transform_indices = @transform_2, window_bounds = array<i64: 9, 4, 4>}, {transform_indices = @transform_3, window_bounds = array<i64: 1, 4, 256>}]} {
    %0 = tpu.iota {dimensions = array<i32: 1>} : vector<1x256xi32>
    %c16_i32 = arith.constant 16 : i32
    %c0_i32 = arith.constant 0 : i32
    %1 = arith.cmpi eq, %c16_i32, %c0_i32 : i32
    %c1_i32 = arith.constant 1 : i32
    %2 = arith.select %1, %c1_i32, %c16_i32 : i32
    %3 = vector.broadcast %2 : i32 to vector<1x256xi32>
    %4 = arith.remsi %0, %3 : vector<1x256xi32>
    %c0_i32_0 = arith.constant 0 : i32
    %5 = vector.broadcast %c0_i32_0 : i32 to vector<1x256xi32>
    %6 = arith.cmpi ne, %4, %5 : vector<1x256xi32>
    %c0_i32_1 = arith.constant 0 : i32
    %7 = vector.broadcast %c0_i32_1 : i32 to vector<1x256xi32>
    %8 = arith.cmpi slt, %4, %7 : vector<1x256xi32>
    %c0_i32_2 = arith.constant 0 : i32
    %9 = arith.cmpi slt, %2, %c0_i32_2 : i32
    %10 = vector.broadcast %9 : i1 to vector<1x256xi1>
    %11 = vector.broadcast %10 : vector<1x256xi1> to vector<1x256xi1>
    %12 = arith.xori %8, %11 : vector<1x256xi1>
    %13 = arith.andi %12, %6 : vector<1x256xi1>
    %14 = vector.broadcast %2 : i32 to vector<1x256xi32>
    %15 = arith.addi %4, %14 : vector<1x256xi32>
    %16 = arith.select %13, %15, %4 : vector<1x256xi1>, vector<1x256xi32>
    %c0_i32_3 = arith.constant 0 : i32
    %17 = vector.broadcast %c0_i32_3 : i32 to vector<1x256xi32>
    %18 = arith.cmpi eq, %16, %17 : vector<1x256xi32>
    %c15_i32 = arith.constant 15 : i32
    %19 = vector.broadcast %c15_i32 : i32 to vector<1x256xi32>
    %20 = arith.cmpi eq, %16, %19 : vector<1x256xi32>
    %c0 = arith.constant 0 : index
    %c0_4 = arith.constant 0 : index
    %c0_5 = arith.constant 0 : index
    %21 = vector.load %arg1[%c0, %c0_4, %c0_5] : memref<1x4x256xf32, #tpu.memory_space<vmem>>, vector<1x4x256xf32>
    %22 = vector.shape_cast %21 : vector<1x4x256xf32> to vector<4x256xf32>
    %23 = arith.truncf %22 : vector<4x256xf32> to vector<4x256xbf16>
    %24 = vector.extract_strided_slice %23 {offsets = [0, 16], sizes = [4, 16], strides = [1, 1]} : vector<4x256xbf16> to vector<4x16xbf16>
    %25 = vector.extract_strided_slice %23 {offsets = [0, 0], sizes = [4, 240], strides = [1, 1]} : vector<4x256xbf16> to vector<4x240xbf16>
    %26 = tpu.concatenate %24, %25 in 1 : vector<4x16xbf16>, vector<4x240xbf16> -> vector<4x256xbf16>
    %27 = vector.extract_strided_slice %23 {offsets = [0, 16], sizes = [4, 240], strides = [1, 1]} : vector<4x256xbf16> to vector<4x240xbf16>
    %28 = vector.extract_strided_slice %23 {offsets = [0, 224], sizes = [4, 16], strides = [1, 1]} : vector<4x256xbf16> to vector<4x16xbf16>
    %29 = tpu.concatenate %27, %28 in 1 : vector<4x240xbf16>, vector<4x16xbf16> -> vector<4x256xbf16>
    %30 = vector.extract_strided_slice %26 {offsets = [0, 255], sizes = [4, 1], strides = [1, 1]} : vector<4x256xbf16> to vector<4x1xbf16>
    %31 = vector.extract_strided_slice %26 {offsets = [0, 0], sizes = [4, 255], strides = [1, 1]} : vector<4x256xbf16> to vector<4x255xbf16>
    %32 = tpu.concatenate %30, %31 in 1 : vector<4x1xbf16>, vector<4x255xbf16> -> vector<4x256xbf16>
    %33 = vector.extract_strided_slice %26 {offsets = [0, 1], sizes = [4, 255], strides = [1, 1]} : vector<4x256xbf16> to vector<4x255xbf16>
    %34 = vector.extract_strided_slice %26 {offsets = [0, 0], sizes = [4, 1], strides = [1, 1]} : vector<4x256xbf16> to vector<4x1xbf16>
    %35 = tpu.concatenate %33, %34 in 1 : vector<4x255xbf16>, vector<4x1xbf16> -> vector<4x256xbf16>
    %36 = vector.shape_cast %18 : vector<1x256xi1> to vector<1x256xi1>
    %37 = vector.broadcast %36 : vector<1x256xi1> to vector<4x256xi1>
    %38 = arith.select %37, %35, %32 : vector<4x256xi1>, vector<4x256xbf16>
    %39 = vector.shape_cast %20 : vector<1x256xi1> to vector<1x256xi1>
    %40 = vector.broadcast %39 : vector<1x256xi1> to vector<4x256xi1>
    %41 = arith.select %40, %32, %35 : vector<4x256xi1>, vector<4x256xbf16>
    %c0_6 = arith.constant 0 : index
    %c0_7 = arith.constant 0 : index
    %c0_8 = arith.constant 0 : index
    %42 = vector.load %arg2[%c0_6, %c0_7, %c0_8] : memref<9x4x4xbf16, #tpu.memory_space<vmem>>, vector<1x4x4xbf16>
    %43 = vector.shape_cast %42 : vector<1x4x4xbf16> to vector<4x4xbf16>
    %cst = arith.constant dense<0.000000e+00> : vector<4x256xf32>
    %44 = tpu.matmul %43, %38, %cst {dimension_numbers = #tpu.dot_dimension_numbers<[1], [0], [0], [1], [0, 0, 1, 1], [], []>} : vector<4x4xbf16>, vector<4x256xbf16>, vector<4x256xf32> -> vector<4x256xf32>
    %c1 = arith.constant 1 : index
    %c0_9 = arith.constant 0 : index
    %c0_10 = arith.constant 0 : index
    %45 = vector.load %arg2[%c1, %c0_9, %c0_10] : memref<9x4x4xbf16, #tpu.memory_space<vmem>>, vector<1x4x4xbf16>
    %46 = vector.shape_cast %45 : vector<1x4x4xbf16> to vector<4x4xbf16>
    %cst_11 = arith.constant dense<0.000000e+00> : vector<4x256xf32>
    %47 = tpu.matmul %46, %26, %cst_11 {dimension_numbers = #tpu.dot_dimension_numbers<[1], [0], [0], [1], [0, 0, 1, 1], [], []>} : vector<4x4xbf16>, vector<4x256xbf16>, vector<4x256xf32> -> vector<4x256xf32>
    %48 = arith.addf %44, %47 : vector<4x256xf32>
    %c2 = arith.constant 2 : index
    %c0_12 = arith.constant 0 : index
    %c0_13 = arith.constant 0 : index
    %49 = vector.load %arg2[%c2, %c0_12, %c0_13] : memref<9x4x4xbf16, #tpu.memory_space<vmem>>, vector<1x4x4xbf16>
    %50 = vector.shape_cast %49 : vector<1x4x4xbf16> to vector<4x4xbf16>
    %cst_14 = arith.constant dense<0.000000e+00> : vector<4x256xf32>
    %51 = tpu.matmul %50, %41, %cst_14 {dimension_numbers = #tpu.dot_dimension_numbers<[1], [0], [0], [1], [0, 0, 1, 1], [], []>} : vector<4x4xbf16>, vector<4x256xbf16>, vector<4x256xf32> -> vector<4x256xf32>
    %52 = arith.addf %48, %51 : vector<4x256xf32>
    %53 = vector.extract_strided_slice %23 {offsets = [0, 255], sizes = [4, 1], strides = [1, 1]} : vector<4x256xbf16> to vector<4x1xbf16>
    %54 = vector.extract_strided_slice %23 {offsets = [0, 0], sizes = [4, 255], strides = [1, 1]} : vector<4x256xbf16> to vector<4x255xbf16>
    %55 = tpu.concatenate %53, %54 in 1 : vector<4x1xbf16>, vector<4x255xbf16> -> vector<4x256xbf16>
    %56 = vector.extract_strided_slice %23 {offsets = [0, 1], sizes = [4, 255], strides = [1, 1]} : vector<4x256xbf16> to vector<4x255xbf16>
    %57 = vector.extract_strided_slice %23 {offsets = [0, 0], sizes = [4, 1], strides = [1, 1]} : vector<4x256xbf16> to vector<4x1xbf16>
    %58 = tpu.concatenate %56, %57 in 1 : vector<4x255xbf16>, vector<4x1xbf16> -> vector<4x256xbf16>
    %59 = vector.shape_cast %18 : vector<1x256xi1> to vector<1x256xi1>
    %60 = vector.broadcast %59 : vector<1x256xi1> to vector<4x256xi1>
    %61 = arith.select %60, %58, %55 : vector<4x256xi1>, vector<4x256xbf16>
    %62 = vector.shape_cast %20 : vector<1x256xi1> to vector<1x256xi1>
    %63 = vector.broadcast %62 : vector<1x256xi1> to vector<4x256xi1>
    %64 = arith.select %63, %55, %58 : vector<4x256xi1>, vector<4x256xbf16>
    %c3 = arith.constant 3 : index
    %c0_15 = arith.constant 0 : index
    %c0_16 = arith.constant 0 : index
    %65 = vector.load %arg2[%c3, %c0_15, %c0_16] : memref<9x4x4xbf16, #tpu.memory_space<vmem>>, vector<1x4x4xbf16>
    %66 = vector.shape_cast %65 : vector<1x4x4xbf16> to vector<4x4xbf16>
    %cst_17 = arith.constant dense<0.000000e+00> : vector<4x256xf32>
    %67 = tpu.matmul %66, %61, %cst_17 {dimension_numbers = #tpu.dot_dimension_numbers<[1], [0], [0], [1], [0, 0, 1, 1], [], []>} : vector<4x4xbf16>, vector<4x256xbf16>, vector<4x256xf32> -> vector<4x256xf32>
    %68 = arith.addf %52, %67 : vector<4x256xf32>
    %c4 = arith.constant 4 : index
    %c0_18 = arith.constant 0 : index
    %c0_19 = arith.constant 0 : index
    %69 = vector.load %arg2[%c4, %c0_18, %c0_19] : memref<9x4x4xbf16, #tpu.memory_space<vmem>>, vector<1x4x4xbf16>
    %70 = vector.shape_cast %69 : vector<1x4x4xbf16> to vector<4x4xbf16>
    %cst_20 = arith.constant dense<0.000000e+00> : vector<4x256xf32>
    %71 = tpu.matmul %70, %23, %cst_20 {dimension_numbers = #tpu.dot_dimension_numbers<[1], [0], [0], [1], [0, 0, 1, 1], [], []>} : vector<4x4xbf16>, vector<4x256xbf16>, vector<4x256xf32> -> vector<4x256xf32>
    %72 = arith.addf %68, %71 : vector<4x256xf32>
    %c5 = arith.constant 5 : index
    %c0_21 = arith.constant 0 : index
    %c0_22 = arith.constant 0 : index
    %73 = vector.load %arg2[%c5, %c0_21, %c0_22] : memref<9x4x4xbf16, #tpu.memory_space<vmem>>, vector<1x4x4xbf16>
    %74 = vector.shape_cast %73 : vector<1x4x4xbf16> to vector<4x4xbf16>
    %cst_23 = arith.constant dense<0.000000e+00> : vector<4x256xf32>
    %75 = tpu.matmul %74, %64, %cst_23 {dimension_numbers = #tpu.dot_dimension_numbers<[1], [0], [0], [1], [0, 0, 1, 1], [], []>} : vector<4x4xbf16>, vector<4x256xbf16>, vector<4x256xf32> -> vector<4x256xf32>
    %76 = arith.addf %72, %75 : vector<4x256xf32>
    %77 = vector.extract_strided_slice %29 {offsets = [0, 255], sizes = [4, 1], strides = [1, 1]} : vector<4x256xbf16> to vector<4x1xbf16>
    %78 = vector.extract_strided_slice %29 {offsets = [0, 0], sizes = [4, 255], strides = [1, 1]} : vector<4x256xbf16> to vector<4x255xbf16>
    %79 = tpu.concatenate %77, %78 in 1 : vector<4x1xbf16>, vector<4x255xbf16> -> vector<4x256xbf16>
    %80 = vector.extract_strided_slice %29 {offsets = [0, 1], sizes = [4, 255], strides = [1, 1]} : vector<4x256xbf16> to vector<4x255xbf16>
    %81 = vector.extract_strided_slice %29 {offsets = [0, 0], sizes = [4, 1], strides = [1, 1]} : vector<4x256xbf16> to vector<4x1xbf16>
    %82 = tpu.concatenate %80, %81 in 1 : vector<4x255xbf16>, vector<4x1xbf16> -> vector<4x256xbf16>
    %83 = vector.shape_cast %18 : vector<1x256xi1> to vector<1x256xi1>
    %84 = vector.broadcast %83 : vector<1x256xi1> to vector<4x256xi1>
    %85 = arith.select %84, %82, %79 : vector<4x256xi1>, vector<4x256xbf16>
    %86 = vector.shape_cast %20 : vector<1x256xi1> to vector<1x256xi1>
    %87 = vector.broadcast %86 : vector<1x256xi1> to vector<4x256xi1>
    %88 = arith.select %87, %79, %82 : vector<4x256xi1>, vector<4x256xbf16>
    %c6 = arith.constant 6 : index
    %c0_24 = arith.constant 0 : index
    %c0_25 = arith.constant 0 : index
    %89 = vector.load %arg2[%c6, %c0_24, %c0_25] : memref<9x4x4xbf16, #tpu.memory_space<vmem>>, vector<1x4x4xbf16>
    %90 = vector.shape_cast %89 : vector<1x4x4xbf16> to vector<4x4xbf16>
    %cst_26 = arith.constant dense<0.000000e+00> : vector<4x256xf32>
    %91 = tpu.matmul %90, %85, %cst_26 {dimension_numbers = #tpu.dot_dimension_numbers<[1], [0], [0], [1], [0, 0, 1, 1], [], []>} : vector<4x4xbf16>, vector<4x256xbf16>, vector<4x256xf32> -> vector<4x256xf32>
    %92 = arith.addf %76, %91 : vector<4x256xf32>
    %c7 = arith.constant 7 : index
    %c0_27 = arith.constant 0 : index
    %c0_28 = arith.constant 0 : index
    %93 = vector.load %arg2[%c7, %c0_27, %c0_28] : memref<9x4x4xbf16, #tpu.memory_space<vmem>>, vector<1x4x4xbf16>
    %94 = vector.shape_cast %93 : vector<1x4x4xbf16> to vector<4x4xbf16>
    %cst_29 = arith.constant dense<0.000000e+00> : vector<4x256xf32>
    %95 = tpu.matmul %94, %29, %cst_29 {dimension_numbers = #tpu.dot_dimension_numbers<[1], [0], [0], [1], [0, 0, 1, 1], [], []>} : vector<4x4xbf16>, vector<4x256xbf16>, vector<4x256xf32> -> vector<4x256xf32>
    %96 = arith.addf %92, %95 : vector<4x256xf32>
    %c8 = arith.constant 8 : index
    %c0_30 = arith.constant 0 : index
    %c0_31 = arith.constant 0 : index
    %97 = vector.load %arg2[%c8, %c0_30, %c0_31] : memref<9x4x4xbf16, #tpu.memory_space<vmem>>, vector<1x4x4xbf16>
    %98 = vector.shape_cast %97 : vector<1x4x4xbf16> to vector<4x4xbf16>
    %cst_32 = arith.constant dense<0.000000e+00> : vector<4x256xf32>
    %99 = tpu.matmul %98, %88, %cst_32 {dimension_numbers = #tpu.dot_dimension_numbers<[1], [0], [0], [1], [0, 0, 1, 1], [], []>} : vector<4x4xbf16>, vector<4x256xbf16>, vector<4x256xf32> -> vector<4x256xf32>
    %100 = arith.addf %96, %99 : vector<4x256xf32>
    %cst_33 = arith.constant dense<0.000000e+00> : vector<4xf32>
    %101 = vector.multi_reduction <add>, %100, %cst_33 [1] : vector<4x256xf32> to vector<4xf32>
    %102 = vector.shape_cast %101 : vector<4xf32> to vector<4x1xf32>
    %cst_34 = arith.constant 3.906250e-03 : f32
    %103 = vector.broadcast %cst_34 : f32 to vector<4x1xf32>
    %104 = arith.mulf %102, %103 : vector<4x1xf32>
    %105 = vector.broadcast %104 : vector<4x1xf32> to vector<4x256xf32>
    %106 = arith.subf %100, %105 : vector<4x256xf32>
    %107 = arith.mulf %106, %106 : vector<4x256xf32>
    %cst_35 = arith.constant dense<0.000000e+00> : vector<4xf32>
    %108 = vector.multi_reduction <add>, %107, %cst_35 [1] : vector<4x256xf32> to vector<4xf32>
    %109 = vector.shape_cast %108 : vector<4xf32> to vector<4x1xf32>
    %cst_36 = arith.constant 3.906250e-03 : f32
    %110 = vector.broadcast %cst_36 : f32 to vector<4x1xf32>
    %111 = arith.mulf %109, %110 : vector<4x1xf32>
    %cst_37 = arith.constant 9.99999974E-6 : f32
    %112 = vector.broadcast %cst_37 : f32 to vector<4x1xf32>
    %113 = arith.addf %111, %112 : vector<4x1xf32>
    %114 = math.rsqrt %113 : vector<4x1xf32>
    %115 = vector.broadcast %114 : vector<4x1xf32> to vector<4x256xf32>
    %116 = arith.mulf %106, %115 : vector<4x256xf32>
    %cst_38 = arith.constant 0.000000e+00 : f32
    %117 = vector.broadcast %cst_38 : f32 to vector<4x256xf32>
    %118 = arith.maximumf %116, %117 : vector<4x256xf32>
    %119 = arith.truncf %118 : vector<4x256xf32> to vector<4x256xbf16>
    %120 = vector.extract_strided_slice %119 {offsets = [0, 16], sizes = [4, 16], strides = [1, 1]} : vector<4x256xbf16> to vector<4x16xbf16>
    %121 = vector.extract_strided_slice %119 {offsets = [0, 0], sizes = [4, 240], strides = [1, 1]} : vector<4x256xbf16> to vector<4x240xbf16>
    %122 = tpu.concatenate %120, %121 in 1 : vector<4x16xbf16>, vector<4x240xbf16> -> vector<4x256xbf16>
    %123 = vector.extract_strided_slice %119 {offsets = [0, 16], sizes = [4, 240], strides = [1, 1]} : vector<4x256xbf16> to vector<4x240xbf16>
    %124 = vector.extract_strided_slice %119 {offsets = [0, 224], sizes = [4, 16], strides = [1, 1]} : vector<4x256xbf16> to vector<4x16xbf16>
    %125 = tpu.concatenate %123, %124 in 1 : vector<4x240xbf16>, vector<4x16xbf16> -> vector<4x256xbf16>
    %126 = vector.extract_strided_slice %122 {offsets = [0, 255], sizes = [4, 1], strides = [1, 1]} : vector<4x256xbf16> to vector<4x1xbf16>
    %127 = vector.extract_strided_slice %122 {offsets = [0, 0], sizes = [4, 255], strides = [1, 1]} : vector<4x256xbf16> to vector<4x255xbf16>
    %128 = tpu.concatenate %126, %127 in 1 : vector<4x1xbf16>, vector<4x255xbf16> -> vector<4x256xbf16>
    %129 = vector.extract_strided_slice %122 {offsets = [0, 1], sizes = [4, 255], strides = [1, 1]} : vector<4x256xbf16> to vector<4x255xbf16>
    %130 = vector.extract_strided_slice %122 {offsets = [0, 0], sizes = [4, 1], strides = [1, 1]} : vector<4x256xbf16> to vector<4x1xbf16>
    %131 = tpu.concatenate %129, %130 in 1 : vector<4x255xbf16>, vector<4x1xbf16> -> vector<4x256xbf16>
    %132 = vector.shape_cast %18 : vector<1x256xi1> to vector<1x256xi1>
    %133 = vector.broadcast %132 : vector<1x256xi1> to vector<4x256xi1>
    %134 = arith.select %133, %131, %128 : vector<4x256xi1>, vector<4x256xbf16>
    %135 = vector.shape_cast %20 : vector<1x256xi1> to vector<1x256xi1>
    %136 = vector.broadcast %135 : vector<1x256xi1> to vector<4x256xi1>
    %137 = arith.select %136, %128, %131 : vector<4x256xi1>, vector<4x256xbf16>
    %c0_39 = arith.constant 0 : index
    %c0_40 = arith.constant 0 : index
    %c0_41 = arith.constant 0 : index
    %138 = vector.load %arg3[%c0_39, %c0_40, %c0_41] : memref<9x4x4xbf16, #tpu.memory_space<vmem>>, vector<1x4x4xbf16>
    %139 = vector.shape_cast %138 : vector<1x4x4xbf16> to vector<4x4xbf16>
    %cst_42 = arith.constant dense<0.000000e+00> : vector<4x256xf32>
    %140 = tpu.matmul %139, %134, %cst_42 {dimension_numbers = #tpu.dot_dimension_numbers<[1], [0], [0], [1], [0, 0, 1, 1], [], []>} : vector<4x4xbf16>, vector<4x256xbf16>, vector<4x256xf32> -> vector<4x256xf32>
    %c1_43 = arith.constant 1 : index
    %c0_44 = arith.constant 0 : index
    %c0_45 = arith.constant 0 : index
    %141 = vector.load %arg3[%c1_43, %c0_44, %c0_45] : memref<9x4x4xbf16, #tpu.memory_space<vmem>>, vector<1x4x4xbf16>
    %142 = vector.shape_cast %141 : vector<1x4x4xbf16> to vector<4x4xbf16>
    %cst_46 = arith.constant dense<0.000000e+00> : vector<4x256xf32>
    %143 = tpu.matmul %142, %122, %cst_46 {dimension_numbers = #tpu.dot_dimension_numbers<[1], [0], [0], [1], [0, 0, 1, 1], [], []>} : vector<4x4xbf16>, vector<4x256xbf16>, vector<4x256xf32> -> vector<4x256xf32>
    %144 = arith.addf %140, %143 : vector<4x256xf32>
    %c2_47 = arith.constant 2 : index
    %c0_48 = arith.constant 0 : index
    %c0_49 = arith.constant 0 : index
    %145 = vector.load %arg3[%c2_47, %c0_48, %c0_49] : memref<9x4x4xbf16, #tpu.memory_space<vmem>>, vector<1x4x4xbf16>
    %146 = vector.shape_cast %145 : vector<1x4x4xbf16> to vector<4x4xbf16>
    %cst_50 = arith.constant dense<0.000000e+00> : vector<4x256xf32>
    %147 = tpu.matmul %146, %137, %cst_50 {dimension_numbers = #tpu.dot_dimension_numbers<[1], [0], [0], [1], [0, 0, 1, 1], [], []>} : vector<4x4xbf16>, vector<4x256xbf16>, vector<4x256xf32> -> vector<4x256xf32>
    %148 = arith.addf %144, %147 : vector<4x256xf32>
    %149 = vector.extract_strided_slice %119 {offsets = [0, 255], sizes = [4, 1], strides = [1, 1]} : vector<4x256xbf16> to vector<4x1xbf16>
    %150 = vector.extract_strided_slice %119 {offsets = [0, 0], sizes = [4, 255], strides = [1, 1]} : vector<4x256xbf16> to vector<4x255xbf16>
    %151 = tpu.concatenate %149, %150 in 1 : vector<4x1xbf16>, vector<4x255xbf16> -> vector<4x256xbf16>
    %152 = vector.extract_strided_slice %119 {offsets = [0, 1], sizes = [4, 255], strides = [1, 1]} : vector<4x256xbf16> to vector<4x255xbf16>
    %153 = vector.extract_strided_slice %119 {offsets = [0, 0], sizes = [4, 1], strides = [1, 1]} : vector<4x256xbf16> to vector<4x1xbf16>
    %154 = tpu.concatenate %152, %153 in 1 : vector<4x255xbf16>, vector<4x1xbf16> -> vector<4x256xbf16>
    %155 = vector.shape_cast %18 : vector<1x256xi1> to vector<1x256xi1>
    %156 = vector.broadcast %155 : vector<1x256xi1> to vector<4x256xi1>
    %157 = arith.select %156, %154, %151 : vector<4x256xi1>, vector<4x256xbf16>
    %158 = vector.shape_cast %20 : vector<1x256xi1> to vector<1x256xi1>
    %159 = vector.broadcast %158 : vector<1x256xi1> to vector<4x256xi1>
    %160 = arith.select %159, %151, %154 : vector<4x256xi1>, vector<4x256xbf16>
    %c3_51 = arith.constant 3 : index
    %c0_52 = arith.constant 0 : index
    %c0_53 = arith.constant 0 : index
    %161 = vector.load %arg3[%c3_51, %c0_52, %c0_53] : memref<9x4x4xbf16, #tpu.memory_space<vmem>>, vector<1x4x4xbf16>
    %162 = vector.shape_cast %161 : vector<1x4x4xbf16> to vector<4x4xbf16>
    %cst_54 = arith.constant dense<0.000000e+00> : vector<4x256xf32>
    %163 = tpu.matmul %162, %157, %cst_54 {dimension_numbers = #tpu.dot_dimension_numbers<[1], [0], [0], [1], [0, 0, 1, 1], [], []>} : vector<4x4xbf16>, vector<4x256xbf16>, vector<4x256xf32> -> vector<4x256xf32>
    %164 = arith.addf %148, %163 : vector<4x256xf32>
    %c4_55 = arith.constant 4 : index
    %c0_56 = arith.constant 0 : index
    %c0_57 = arith.constant 0 : index
    %165 = vector.load %arg3[%c4_55, %c0_56, %c0_57] : memref<9x4x4xbf16, #tpu.memory_space<vmem>>, vector<1x4x4xbf16>
    %166 = vector.shape_cast %165 : vector<1x4x4xbf16> to vector<4x4xbf16>
    %cst_58 = arith.constant dense<0.000000e+00> : vector<4x256xf32>
    %167 = tpu.matmul %166, %119, %cst_58 {dimension_numbers = #tpu.dot_dimension_numbers<[1], [0], [0], [1], [0, 0, 1, 1], [], []>} : vector<4x4xbf16>, vector<4x256xbf16>, vector<4x256xf32> -> vector<4x256xf32>
    %168 = arith.addf %164, %167 : vector<4x256xf32>
    %c5_59 = arith.constant 5 : index
    %c0_60 = arith.constant 0 : index
    %c0_61 = arith.constant 0 : index
    %169 = vector.load %arg3[%c5_59, %c0_60, %c0_61] : memref<9x4x4xbf16, #tpu.memory_space<vmem>>, vector<1x4x4xbf16>
    %170 = vector.shape_cast %169 : vector<1x4x4xbf16> to vector<4x4xbf16>
    %cst_62 = arith.constant dense<0.000000e+00> : vector<4x256xf32>
    %171 = tpu.matmul %170, %160, %cst_62 {dimension_numbers = #tpu.dot_dimension_numbers<[1], [0], [0], [1], [0, 0, 1, 1], [], []>} : vector<4x4xbf16>, vector<4x256xbf16>, vector<4x256xf32> -> vector<4x256xf32>
    %172 = arith.addf %168, %171 : vector<4x256xf32>
    %173 = vector.extract_strided_slice %125 {offsets = [0, 255], sizes = [4, 1], strides = [1, 1]} : vector<4x256xbf16> to vector<4x1xbf16>
    %174 = vector.extract_strided_slice %125 {offsets = [0, 0], sizes = [4, 255], strides = [1, 1]} : vector<4x256xbf16> to vector<4x255xbf16>
    %175 = tpu.concatenate %173, %174 in 1 : vector<4x1xbf16>, vector<4x255xbf16> -> vector<4x256xbf16>
    %176 = vector.extract_strided_slice %125 {offsets = [0, 1], sizes = [4, 255], strides = [1, 1]} : vector<4x256xbf16> to vector<4x255xbf16>
    %177 = vector.extract_strided_slice %125 {offsets = [0, 0], sizes = [4, 1], strides = [1, 1]} : vector<4x256xbf16> to vector<4x1xbf16>
    %178 = tpu.concatenate %176, %177 in 1 : vector<4x255xbf16>, vector<4x1xbf16> -> vector<4x256xbf16>
    %179 = vector.shape_cast %18 : vector<1x256xi1> to vector<1x256xi1>
    %180 = vector.broadcast %179 : vector<1x256xi1> to vector<4x256xi1>
    %181 = arith.select %180, %178, %175 : vector<4x256xi1>, vector<4x256xbf16>
    %182 = vector.shape_cast %20 : vector<1x256xi1> to vector<1x256xi1>
    %183 = vector.broadcast %182 : vector<1x256xi1> to vector<4x256xi1>
    %184 = arith.select %183, %175, %178 : vector<4x256xi1>, vector<4x256xbf16>
    %c6_63 = arith.constant 6 : index
    %c0_64 = arith.constant 0 : index
    %c0_65 = arith.constant 0 : index
    %185 = vector.load %arg3[%c6_63, %c0_64, %c0_65] : memref<9x4x4xbf16, #tpu.memory_space<vmem>>, vector<1x4x4xbf16>
    %186 = vector.shape_cast %185 : vector<1x4x4xbf16> to vector<4x4xbf16>
    %cst_66 = arith.constant dense<0.000000e+00> : vector<4x256xf32>
    %187 = tpu.matmul %186, %181, %cst_66 {dimension_numbers = #tpu.dot_dimension_numbers<[1], [0], [0], [1], [0, 0, 1, 1], [], []>} : vector<4x4xbf16>, vector<4x256xbf16>, vector<4x256xf32> -> vector<4x256xf32>
    %188 = arith.addf %172, %187 : vector<4x256xf32>
    %c7_67 = arith.constant 7 : index
    %c0_68 = arith.constant 0 : index
    %c0_69 = arith.constant 0 : index
    %189 = vector.load %arg3[%c7_67, %c0_68, %c0_69] : memref<9x4x4xbf16, #tpu.memory_space<vmem>>, vector<1x4x4xbf16>
    %190 = vector.shape_cast %189 : vector<1x4x4xbf16> to vector<4x4xbf16>
    %cst_70 = arith.constant dense<0.000000e+00> : vector<4x256xf32>
    %191 = tpu.matmul %190, %125, %cst_70 {dimension_numbers = #tpu.dot_dimension_numbers<[1], [0], [0], [1], [0, 0, 1, 1], [], []>} : vector<4x4xbf16>, vector<4x256xbf16>, vector<4x256xf32> -> vector<4x256xf32>
    %192 = arith.addf %188, %191 : vector<4x256xf32>
    %c8_71 = arith.constant 8 : index
    %c0_72 = arith.constant 0 : index
    %c0_73 = arith.constant 0 : index
    %193 = vector.load %arg3[%c8_71, %c0_72, %c0_73] : memref<9x4x4xbf16, #tpu.memory_space<vmem>>, vector<1x4x4xbf16>
    %194 = vector.shape_cast %193 : vector<1x4x4xbf16> to vector<4x4xbf16>
    %cst_74 = arith.constant dense<0.000000e+00> : vector<4x256xf32>
    %195 = tpu.matmul %194, %184, %cst_74 {dimension_numbers = #tpu.dot_dimension_numbers<[1], [0], [0], [1], [0, 0, 1, 1], [], []>} : vector<4x4xbf16>, vector<4x256xbf16>, vector<4x256xf32> -> vector<4x256xf32>
    %196 = arith.addf %192, %195 : vector<4x256xf32>
    %cst_75 = arith.constant dense<0.000000e+00> : vector<4xf32>
    %197 = vector.multi_reduction <add>, %196, %cst_75 [1] : vector<4x256xf32> to vector<4xf32>
    %198 = vector.shape_cast %197 : vector<4xf32> to vector<4x1xf32>
    %cst_76 = arith.constant 3.906250e-03 : f32
    %199 = vector.broadcast %cst_76 : f32 to vector<4x1xf32>
    %200 = arith.mulf %198, %199 : vector<4x1xf32>
    %201 = vector.broadcast %200 : vector<4x1xf32> to vector<4x256xf32>
    %202 = arith.subf %196, %201 : vector<4x256xf32>
    %203 = arith.mulf %202, %202 : vector<4x256xf32>
    %cst_77 = arith.constant dense<0.000000e+00> : vector<4xf32>
    %204 = vector.multi_reduction <add>, %203, %cst_77 [1] : vector<4x256xf32> to vector<4xf32>
    %205 = vector.shape_cast %204 : vector<4xf32> to vector<4x1xf32>
    %cst_78 = arith.constant 3.906250e-03 : f32
    %206 = vector.broadcast %cst_78 : f32 to vector<4x1xf32>
    %207 = arith.mulf %205, %206 : vector<4x1xf32>
    %cst_79 = arith.constant 9.99999974E-6 : f32
    %208 = vector.broadcast %cst_79 : f32 to vector<4x1xf32>
    %209 = arith.addf %207, %208 : vector<4x1xf32>
    %210 = math.rsqrt %209 : vector<4x1xf32>
    %211 = vector.broadcast %210 : vector<4x1xf32> to vector<4x256xf32>
    %212 = arith.mulf %202, %211 : vector<4x256xf32>
    %213 = arith.addf %22, %212 : vector<4x256xf32>
    %c0_80 = arith.constant 0 : index
    %c0_81 = arith.constant 0 : index
    %c0_82 = arith.constant 0 : index
    %214 = vector.load %arg4[%c0_80, %c0_81, %c0_82] : memref<1x4x256xf32, #tpu.memory_space<vmem>>, vector<1x4x256xf32>
    %215 = vector.shape_cast %214 : vector<1x4x256xf32> to vector<4x256xf32>
    %216 = vector.shape_cast %213 : vector<4x256xf32> to vector<1x4x256xf32>
    tpu.vector_store %arg4[%c0_80, %c0_81, %c0_82], %216 {strides = array<i32>} : memref<1x4x256xf32, #tpu.memory_space<vmem>>, vector<1x4x256xf32>,
    return
  }
  func.func @transform_0(%arg0: i32) -> (i32, i32, i32) {
    %c0_i32 = arith.constant 0 : i32
    %c0_i32_0 = arith.constant 0 : i32
    %c0_i32_1 = arith.constant 0 : i32
    return %arg0, %c0_i32, %c0_i32_0 : i32, i32, i32
  }
  func.func @transform_1(%arg0: i32) -> (i32, i32, i32) {
    %c0_i32 = arith.constant 0 : i32
    %c0_i32_0 = arith.constant 0 : i32
    %c0_i32_1 = arith.constant 0 : i32
    %c0_i32_2 = arith.constant 0 : i32
    return %c0_i32, %c0_i32_0, %c0_i32_1 : i32, i32, i32
  }
  func.func @transform_2(%arg0: i32) -> (i32, i32, i32) {
    %c0_i32 = arith.constant 0 : i32
    %c0_i32_0 = arith.constant 0 : i32
    %c0_i32_1 = arith.constant 0 : i32
    %c0_i32_2 = arith.constant 0 : i32
    return %c0_i32, %c0_i32_0, %c0_i32_1 : i32, i32, i32
  }
  func.func @transform_3(%arg0: i32) -> (i32, i32, i32) {
    %c0_i32 = arith.constant 0 : i32
    %c0_i32_0 = arith.constant 0 : i32
    %c0_i32_1 = arith.constant 0 : i32
    return %arg0, %c0_i32, %c0_i32_0 : i32, i32, i32
  }
}

</mosaic_0001>

<bundles_post_ra>
// kernel: tpu_custom_call.1
= control target key start
LH: loop header
LB: loop body
LE: loop exit
PB: predicated region body
PF: predicated region fallthrough
CT: control target
= control target key end

     0   :  { %8 = vsyncpa [#allocation3], 0  ;;  %s2109_s0 = inlined_call_operand.vmem [shape: f32[2,4,256], index: 0, kind: input, shape index: {}]   ;;  %s2110_s1 = inlined_call_operand.vmem [shape: bf16[9,4,4], index: 1, kind: input, shape index: {}]   ;;  %s2111_s2 = inlined_call_operand.vmem [shape: bf16[9,4,4], index: 2, kind: input, shape index: {}]   ;;  %s2112_s3 = inlined_call_operand.hbm [shape: f32[2,4,256], index: 3, kind: output, shape index: {}]  }
   0x1   :  { %10 = vsyncpa [#allocation3 + $0x1], 0  ;;  %s1721_s12 = smov 0   ;;  %s1723_s13 = smov 0  }
   0x2   :  { %s1725_s14 = smov 0   ;;  %s1727_s15 = smov 0  }
   0x3 LB: > { %s1742_s16 = sadd.s32 4294967295, %s1693_s15   ;;  %s1518_s17 = sadd.s32 4294967294, %s1693_s15   ;;  %s1693_s15 = sphi %s1727_s15, %s2118_s15   ;;  %s1689_s14 = sphi %s1725_s14, %s2117_s14   ;;  %s1685_s13 = sphi %s1723_s13, %s2116_s13   ;;  %s1681_s12 = sphi %s1721_s12, %s2115_s12  }
   0x4   : > { %s1746_s18 = sadd.s32 1, %s1693_s15   ;;  %s91_s19 = sadd.s32 1, %s1689_s14 }
   0x5   : > { %s88_s20 = ssub.s32 %s1693_s15, %s1746_s18  ;;  %p101_p0 = scmp.ne.s32.totalorder %s1689_s14, %s1685_s13 }
   0x6   : > { %p89_p1 = scmp.eq.s32.totalorder %s88_s20, 0  ;;  %p102_p2 = scmp.eq.s32.totalorder %s1742_s16, 1 }
   0x7   : > { %p107_p3 = scmp.ne.s32.totalorder %s1685_s13, %s1681_s12  ;;  %p108_p4 = scmp.eq.s32.totalorder %s1518_s17, 1 }
   0x8   : > { %s1757_s21 = scalar_select %p89_p1, %s1689_s14, %s91_s19  }
   0x9   : > { %p1759_p5 = por %p102_p2, %p101_p0  ;;  %p1763_p6 = por %p108_p4, %p107_p3 }
   0xa   : > { %p1521_p7 = scmp.ge.s32.totalorder %s1693_s15, 1  ;;  %p140_p8 = scmp.lt.s32.totalorder %s1693_s15, 3 }
   0xc   : > { %p141_p9 = pnand %p1521_p7, %p140_p8 }
   0xd   : > { %p164_p10 = scmp.lt.s32.totalorder (!%p141_p9), %s1742_s16, 1  ;;  %s1695_s29 = smov (!%p141_p9), 112  }
   0xe   : > { %144 = sbr.rel (%p141_p9) target bundleno = 1599 (0x63f), region = 32  ;;  %s1696_s30 = smov (!%p141_p9), 16  }
   0xf   : > { %s1698_s4 = smov (!%p141_p9), 127   ;;  %s1699_s5 = smov (!%p141_p9), 1  }
  0x13   : > { %s165_s24 = scalar_select %p164_p10, %s1742_s16, 1  ;;  %v1697_v4 = vmov 0   ;;  %vm217_vm0 = vcmask 130048   ;;  %vm299_vm1 = vcmask 1041408   ;;  %v1525_v11 = vld [vmem:[%s2110_s1 + $0x2] sm:$0x3]  ;;  %v172_v15 = vlaneseq }
  0x14   : > { %337 = vmatprep.mubr.bf16.mxu0 %v1697_v4  ;;  %387 = vmatprep.mubr.bf16.mxu1 %v1697_v4  ;;  %vm295_vm2 = vcmask 31744   ;;  %vm225_vm3 = vcmask 916480   ;;  %vm236_vm10 = vcmask 7168   ;;  %vm248_vm11 = vcmask 1039360   ;;  %v292_v45 = vld [vmem:[%s2110_s1] sm:$0x3] }
  0x15   : > { %s1582_s25 = sshll.u32 %s165_s24, 3  ;;  %v173_v16 = vand.u32 127, %v172_v15  ;;  %v263_v20 = vshrl.u32 %v172_v15, 7  ;;  %v1530_v46 = vld [vmem:[%s2110_s1 + $0x4] sm:$0x3] }
  0x16   : > { %s168_s28 = scalar_lea.vmem %s2109_s0, %s1582_s25  ;;  %v1533_v61 = vld [vmem:[%s2110_s1 + $0x6] sm:$0x3]  ;;  %v1536_v62 = vld [vmem:[%s2110_s1 + $0x8] sm:$0x3]  ;;  %v1542_v15 = vld [vmem:[%s2110_s1 + $0xc] sm:$0x3] }
  0x17   : > { %v1774_v0 = vld [vmem:[%s168_s28] sm:$0xff]  ;;  %v174_v17 = vadd.s32 128, %v173_v16  ;;  %v179_v18 = vand.u32 15, %v173_v16  ;;  %v264_v21 = vsub.s32 0, %v263_v20  ;;  %v268_v22 = vsub.s32 4, %v263_v20  ;;  %s1700_s25 = smov [#allocation2]  }
  0x18   : > { %v1778_v1 = vpack.c.bf16 %v1774_v0, %v1774_v0  ;;  %v205_v2 = vcombine.high %v1774_v0, %v1774_v0  ;;  %s1637_s26 = sshll.u32 %s1700_s25, 4  ;;  %s1638_s26 = int_to_ptr.vmem [resolvable:$false] %s1637_s26 }
  0x19   : > { %v186_v19 = vand.u32 15, %v174_v17  ;;  %vm201_vm4 = vcmp.eq.s32.totalorder %v179_v18, 15  ;;  %vm199_vm6 = vcmp.eq.s32.totalorder %v179_v18, 0  ;;  %v1545_v18 = vld [vmem:[%s2110_s1 + $0xe] sm:$0x3] }
  0x1a   : > { %210 = vrot.lane.b32.xlu0 %v1778_v1, %s1695_s29  ;;  %v1784_v3 = vpack.c.bf16 %v205_v2, %v205_v2  ;;  %v534_v47 = vsel %vm299_vm1, %v1778_v1, 0 }
  0x1b   : > { %vm202_vm5 = vcmp.eq.s32.totalorder %v186_v19, 15  ;;  %vm200_vm7 = vcmp.eq.s32.totalorder %v186_v19, 0  ;;  %v1548_v19 = vld [vmem:[%s2110_s1 + $0x10] sm:$0x3] }
  0x1c   : > { %215 = vrot.lane.b32.xlu1 %v1784_v3, %s1696_s30  ;;  %vm278_vm8 = vmpackc.low %vm202_vm5, %vm201_vm4  ;;  %vm822_vm4 = vcmask 1043456  }
  0x1d   : > { %vm260_vm9 = vmpackc.low %vm200_vm7, %vm199_vm6  ;;  %v279_v23 = vsel %vm278_vm8, 65537, %v1697_v4 }
  0x1e   : > { %213 = vrot.lane.b32.xlu0 %v1778_v1, %s1696_s30  ;;  %v261_v24 = vsel %vm260_vm9, 65537, %v1697_v4  ;;  %v1831_v25 = vrot.slane %v279_v23, %v264_v21  ;;  %v1835_v27 = vrot.slane %v279_v23, %v268_v22 }
  0x1f   : > { %v1833_v26 = vrot.slane %v261_v24, %v268_v22  ;;  %v1837_v28 = vrot.slane %v261_v24, %v264_v21 }
  0x20   : > { %223 = vrot.lane.b32.xlu1 %v1784_v3, %s1695_s29  ;;  %vm288_vm12 = vcmp.ne.s16.totalorder %v1831_v25, 0  ;;  %vm289_vm14 = vcmp.ne.s16.totalorder %v1835_v27, 0 }
  0x21   : > { %vm271_vm13 = vcmp.ne.s16.totalorder %v1833_v26, 0  ;;  %vm270_vm15 = vcmp.ne.s16.totalorder %v1837_v28, 0  ;;  %v1568_v26 = vld [vmem:[%s2111_s2 + $0xc] sm:$0x3]  ;;  %v1571_v28 = vld [vmem:[%s2111_s2 + $0xe] sm:$0x3] }
  0x8c   : > { %v211_v5 = vpop.permute.xlu0 %210 }
  0x8e   : > { %v216_v6 = vpop.permute.xlu1 %215 }
  0x90   : > { %v214_v7 = vpop.permute.xlu0 %213 }
  0x91   : > { %v222_v8 = vsel %vm217_vm0, %v211_v5, %v214_v7  ;;  %v218_v9 = vsel %vm217_vm0, %v214_v7, %v216_v6 }
  0x92   : > { %244 = vrot.lane.b32.xlu0 %v222_v8, %s1698_s4  ;;  %234 = vrot.lane.b32.xlu1 %v222_v8, %s1699_s5  ;;  %v300_v10 = vsel %vm299_vm1, %v222_v8, 0  ;;  %v224_v12 = vpop.permute.xlu1 %223 }
  0x93   : > { %1526 = vmatprep.subr.msk.bf16.mxu0 %vm299_vm1, %v218_v9  ;;  %v1816_v13 = vsel %vm225_vm3, %v224_v12, %v216_v6  ;;  %v1819_v14 = vsel %vm225_vm3, %v211_v5, %v224_v12 }
  0x94   : > { %320 = vmatpush1.bf16.msra.mxu0 %v300_v10  ;;  %v721_v16 = vsel %vm299_vm1, %v1819_v14, 0 }
  0x96   : > { %246 = vrot.lane.b32.xlu1 %v218_v9, %s1698_s4  ;;  %231 = vrot.lane.b32.xlu0 %v218_v9, %s1699_s5 }
  0x97   : > { %1527 = vmatmul.mubr.msk.bf16.vlgmr.msra.gmra.mxu0 %vm295_vm2, %v1525_v11 }
  0x98   : > { %439 = vmatprep.mubr.bf16.mxu0 %v1697_v4 }
  0x9a   : > { %452 = vrot.lane.b32.xlu1 %v1778_v1, %s1699_s5  ;;  %450 = vrot.lane.b32.xlu0 %v1784_v3, %s1699_s5 }
  0x9e   : > { %462 = vrot.lane.b32.xlu1 %v1784_v3, %s1698_s4  ;;  %460 = vrot.lane.b32.xlu0 %v1778_v1, %s1698_s4 }
  0xa2   : > { %637 = vrot.lane.b32.xlu0 %v1816_v13, %s1699_s5  ;;  %639 = vrot.lane.b32.xlu1 %v1819_v14, %s1699_s5 }
  0xa6   : > { %647 = vrot.lane.b32.xlu0 %v1819_v14, %s1698_s4  ;;  %649 = vrot.lane.b32.xlu1 %v1816_v13, %s1698_s4 }
 0x104   : > { %v245_v29 = vpop.permute.xlu0 %244  ;;  %v235_v30 = vpop.permute.xlu1 %234 }
 0x108   : > { %v232_v31 = vpop.permute.xlu0 %231  ;;  %v247_v32 = vpop.permute.xlu1 %246 }
 0x109   : > { %v237_v33 = vsel %vm236_vm10, %v235_v30, %v232_v31  ;;  %v242_v34 = vsel %vm236_vm10, %v232_v31, %v235_v30  ;;  %v249_v35 = vsel %vm248_vm11, %v245_v29, %v247_v32  ;;  %v254_v36 = vsel %vm248_vm11, %v247_v32, %v245_v29 }
 0x10a   : > { %v290_v37 = vsel %vm288_vm12, %v242_v34, %v249_v35  ;;  %v273_v38 = vsel %vm271_vm13, %v254_v36, %v237_v33  ;;  %v291_v39 = vsel %vm289_vm14, %v237_v33, %v254_v36  ;;  %v272_v40 = vsel %vm270_vm15, %v249_v35, %v242_v34 }
 0x10b   : > { %1528 = vmatprep.subr.msk.bf16.mxu1 %vm299_vm1, %v273_v38  ;;  %1531 = vmatprep.subr.msk.bf16.mxu0 %vm299_vm1, %v291_v39  ;;  %v350_v41 = vsel %vm299_vm1, %v272_v40, 0  ;;  %v402_v42 = vsel %vm299_vm1, %v290_v37, 0 }
 0x10c   : > { %v451_v43 = vpop.permute.xlu0 %450  ;;  %370 = vmatpush1.bf16.msra.mxu1 %v350_v41  ;;  %422 = vmatpush1.bf16.msra.mxu0 %v402_v42  ;;  %v453_v44 = vpop.permute.xlu1 %452 }
 0x10d   : > { %1537 = vmatprep.subr.msk.bf16.mxu0 %vm299_vm1, %v1784_v3  ;;  %v454_v50 = vsel %vm236_vm10, %v453_v44, %v451_v43  ;;  %v458_v51 = vsel %vm236_vm10, %v451_v43, %v453_v44 }
 0x10f   : > { %1529 = vmatmul.mubr.msk.bf16.vlgmr.msra.gmra.mxu1 %vm295_vm2, %v292_v45  ;;  %1532 = vmatmul.mubr.msk.bf16.vlgmr.msra.gmra.mxu0 %vm295_vm2, %v1530_v46 }
 0x110   : > { %v461_v48 = vpop.permute.xlu0 %460  ;;  %v463_v49 = vpop.permute.xlu1 %462  ;;  %554 = vmatpush1.bf16.msra.mxu0 %v534_v47  ;;  %517 = vmatprep.mubr.bf16.mxu1 %v1697_v4 }
 0x111   : > { %v464_v52 = vsel %vm248_vm11, %v461_v48, %v463_v49  ;;  %v468_v53 = vsel %vm248_vm11, %v463_v49, %v461_v48  ;;  %571 = vmatprep.mubr.bf16.mxu0 %v1697_v4 }
 0x112   : > { %v470_v54 = vsel %vm270_vm15, %v464_v52, %v458_v51  ;;  %v471_v55 = vsel %vm271_vm13, %v468_v53, %v454_v50  ;;  %v472_v57 = vsel %vm288_vm12, %v458_v51, %v464_v52  ;;  %v473_v60 = vsel %vm289_vm14, %v454_v50, %v468_v53 }
 0x113   : > { %1534 = vmatprep.subr.msk.bf16.mxu1 %vm299_vm1, %v471_v55  ;;  %v480_v56 = vsel %vm299_vm1, %v470_v54, 0  ;;  %v588_v63 = vsel %vm299_vm1, %v472_v57, 0 }
 0x114   : > { %v638_v58 = vpop.permute.xlu0 %637  ;;  %500 = vmatpush1.bf16.msra.mxu1 %v480_v56  ;;  %v640_v59 = vpop.permute.xlu1 %639 }
 0x115   : > { %1540 = vmatprep.subr.msk.bf16.mxu1 %vm299_vm1, %v473_v60  ;;  %v641_v1 = vsel %vm236_vm10, %v640_v59, %v638_v58  ;;  %v645_v5 = vsel %vm236_vm10, %v638_v58, %v640_v59 }
 0x117   : > { %1535 = vmatmul.mubr.msk.bf16.vlgmr.msra.gmra.mxu1 %vm295_vm2, %v1533_v61  ;;  %1538 = vmatmul.mubr.msk.bf16.vlgmr.msra.gmra.mxu0 %vm295_vm2, %v1536_v62 }
 0x118   : > { %v648_v2 = vpop.permute.xlu0 %647  ;;  %608 = vmatpush1.bf16.msra.mxu1 %v588_v63  ;;  %v650_v3 = vpop.permute.xlu1 %649  ;;  %625 = vmatprep.mubr.bf16.mxu1 %v1697_v4 }
 0x119   : > { %v651_v6 = vsel %vm248_vm11, %v648_v2, %v650_v3  ;;  %v655_v7 = vsel %vm248_vm11, %v650_v3, %v648_v2  ;;  %1546 = vmatprep.subr.msk.bf16.mxu1 %vm299_vm1, %v1816_v13  ;;  %704 = vmatprep.mubr.bf16.mxu0 %v1697_v4  ;;  %v1539_v13 = vld [vmem:[%s2110_s1 + $0xa] sm:$0x3] }
 0x11a   : > { %v657_v8 = vsel %vm270_vm15, %v651_v6, %v645_v5  ;;  %v658_v9 = vsel %vm271_vm13, %v655_v7, %v641_v1  ;;  %v659_v11 = vsel %vm288_vm12, %v645_v5, %v651_v6  ;;  %v660_v12 = vsel %vm289_vm14, %v641_v1, %v655_v7 }
 0x11b   : > { %1543 = vmatprep.subr.msk.bf16.mxu0 %vm299_vm1, %v658_v9  ;;  %v667_v10 = vsel %vm299_vm1, %v657_v8, 0  ;;  %v774_v17 = vsel %vm299_vm1, %v659_v11, 0 }
 0x11c   : > { %687 = vmatpush1.bf16.msra.mxu0 %v667_v10 }
 0x11d   : > { %1549 = vmatprep.subr.msk.bf16.mxu0 %vm299_vm1, %v660_v12 }
 0x11f   : > { %1541 = vmatmul.mubr.msk.bf16.vlgmr.msra.gmra.mxu1 %vm295_vm2, %v1539_v13  ;;  %1544 = vmatmul.mubr.msk.bf16.vlgmr.msra.gmra.mxu0 %vm295_vm2, %v1542_v15 }
 0x120   : > { %740 = vmatpush1.bf16.msra.mxu1 %v721_v16  ;;  %794 = vmatpush1.bf16.msra.mxu0 %v774_v17 }
 0x121   : > { %757 = vmatprep.mubr.bf16.mxu1 %v1697_v4  ;;  %811 = vmatprep.mubr.bf16.mxu0 %v1697_v4 }
 0x127   : > { %1547 = vmatmul.mubr.msk.bf16.vlgmr.msra.gmra.mxu1 %vm295_vm2, %v1545_v18  ;;  %1550 = vmatmul.mubr.msk.bf16.vlgmr.msra.gmra.mxu0 %vm295_vm2, %v1548_v19 }
 0x128   : > { %933 = vmatprep.mubr.bf16.mxu1 %v1697_v4  ;;  %983 = vmatprep.mubr.bf16.mxu0 %v1697_v4 }
 0x157   : > { %v339_v14 = vpop.f32.mrf.mxu0 }
 0x159   : > { %v341_v20 = vpop.f32.mrf.mxu0 }
 0x15b   : > { %v343_v21 = vpop.f32.mrf.mxu0 }
 0x15d   : > { %v344_v22 = vpop.f32.mrf.mxu0 }
 0x1cf   : > { %v389_v23 = vpop.f32.mrf.mxu1  ;;  %v441_v24 = vpop.f32.mrf.mxu0 }
 0x1d0   : > { %v390_v35 = vadd.f32 %v389_v23, %v339_v14 }
 0x1d1   : > { %v391_v29 = vpop.f32.mrf.mxu1  ;;  %v443_v30 = vpop.f32.mrf.mxu0 }
 0x1d2   : > { %v392_v38 = vadd.f32 %v391_v29, %v341_v20  ;;  %v448_v41 = vadd.f32 %v441_v24, %v390_v35 }
 0x1d3   : > { %v393_v31 = vpop.f32.mrf.mxu1  ;;  %v445_v32 = vpop.f32.mrf.mxu0 }
 0x1d4   : > { %v449_v44 = vadd.f32 %v443_v30, %v392_v38 }
 0x1d5   : > { %v394_v33 = vpop.f32.mrf.mxu1  ;;  %v446_v34 = vpop.f32.mrf.mxu0 }
 0x1d7   : > { %v519_v36 = vpop.f32.mrf.mxu1  ;;  %v573_v37 = vpop.f32.mrf.mxu0 }
 0x1d8   : > { %v526_v45 = vadd.f32 %v519_v36, %v448_v41 }
 0x1d9   : > { %v521_v39 = vpop.f32.mrf.mxu1  ;;  %v575_v40 = vpop.f32.mrf.mxu0 }
 0x1da   : > { %v527_v48 = vadd.f32 %v521_v39, %v449_v44  ;;  %v580_v51 = vadd.f32 %v573_v37, %v526_v45  ;;  %v1551_v45 = vld [vmem:[%s2111_s2 + $0x2] sm:$0x3] }
 0x1db   : > { %v523_v42 = vpop.f32.mrf.mxu1  ;;  %v577_v43 = vpop.f32.mrf.mxu0 }
 0x1dc   : > { %v581_v54 = vadd.f32 %v575_v40, %v527_v48 }
 0x1dd   : > { %v524_v46 = vpop.f32.mrf.mxu1  ;;  %v578_v47 = vpop.f32.mrf.mxu0 }
 0x1df   : > { %v627_v49 = vpop.f32.mrf.mxu1  ;;  %v706_v50 = vpop.f32.mrf.mxu0 }
 0x1e0   : > { %v634_v55 = vadd.f32 %v627_v49, %v580_v51 }
 0x1e1   : > { %v629_v52 = vpop.f32.mrf.mxu1  ;;  %v708_v53 = vpop.f32.mrf.mxu0 }
 0x1e2   : > { %v635_v58 = vadd.f32 %v629_v52, %v581_v54  ;;  %v713_v61 = vadd.f32 %v706_v50, %v634_v55 }
 0x1e3   : > { %v631_v56 = vpop.f32.mrf.mxu1  ;;  %v710_v57 = vpop.f32.mrf.mxu0 }
 0x1e4   : > { %v714_v1 = vadd.f32 %v708_v53, %v635_v58 }
 0x1e5   : > { %v632_v59 = vpop.f32.mrf.mxu1  ;;  %v711_v60 = vpop.f32.mrf.mxu0 }
 0x1e7   : > { %v759_v62 = vpop.f32.mrf.mxu1  ;;  %v813_v63 = vpop.f32.mrf.mxu0 }
 0x1e8   : > { %v766_v2 = vadd.f32 %v759_v62, %v713_v61 }
 0x1e9   : > { %v761_v3 = vpop.f32.mrf.mxu1  ;;  %v815_v5 = vpop.f32.mrf.mxu0 }
 0x1ea   : > { %v820_v6 = vadd.f32 %v813_v63, %v766_v2  ;;  %v767_v7 = vadd.f32 %v761_v3, %v714_v1  ;;  %v890_v3 = vld [vmem:[%s2111_s2] sm:$0x3] }
 0x1eb   : > { %v763_v8 = vpop.f32.mrf.mxu1  ;;  %v817_v9 = vpop.f32.mrf.mxu0 }
 0x1ec   : > { %v821_v10 = vadd.f32 %v815_v5, %v767_v7  ;;  %v823_v13 = vsel %vm822_vm4, %v820_v6, 0.0  ;;  %v1556_v5 = vld [vmem:[%s2111_s2 + $0x4] sm:$0x3] }
 0x1ed   : > { %v764_v11 = vpop.f32.mrf.mxu1  ;;  %v818_v12 = vpop.f32.mrf.mxu0 }
 0x1ee   : > { %v824_v15 = vsel %vm822_vm4, %v821_v10, 0.0 }
 0x1ef   : > { %v825_v16 = vadd.f32 %v824_v15, %v823_v13 }
 0x1f1   : > { %826 = vadd.xlane.f32.xlu0 %v825_v16 }
 0x27a   : > { %v827_v17 = vpop.xlane.xlu0 %826 }
 0x27b   : > { %v828_v18 = vmul.f32 0.00390625, %v827_v17 }
 0x27d   : > { %v829_v19 = vsub.f32 %v820_v6, %v828_v18  ;;  %v830_v14 = vsub.f32 %v821_v10, %v828_v18 }
 0x27f   : > { %v831_v20 = vmul.f32 %v829_v19, %v829_v19  ;;  %v832_v21 = vmul.f32 %v830_v14, %v830_v14 }
 0x281   : > { %v833_v22 = vsel %vm822_vm4, %v831_v20, 0.0  ;;  %v834_v23 = vsel %vm822_vm4, %v832_v21, 0.0  ;;  %v1562_v20 = vld [vmem:[%s2111_s2 + $0x8] sm:$0x3] }
 0x282   : > { %v835_v24 = vadd.f32 %v834_v23, %v833_v22 }
 0x284   : > { %836 = vadd.xlane.f32.xlu1 %v835_v24 }
 0x30d   : > { %v837_v29 = vpop.xlane.xlu1 %836 }
 0x30e   : > { %v838_v30 = vmul.f32 0.00390625, %v837_v29 }
 0x310   : > { %v839_v31 = vadd.f32 1e-05, %v838_v30 }
 0x312   : > { %1629 = vrsqrt.f32 %v839_v31 }
 0x31f   : > { %v1630_v32 = vpop.eup %1629 }
 0x320   : > { %v841_v33 = vmul.f32 %v1630_v32, %v829_v19  ;;  %v842_v34 = vmul.f32 %v1630_v32, %v830_v14  ;;  %v1559_v14 = vld [vmem:[%s2111_s2 + $0x6] sm:$0x3] }
 0x322   : > { %v843_v35 = vmax.f32 %v841_v33, 0.0  ;;  %v844_v37 = vmax.f32 %v842_v34, 0.0 }
 0x324   : > { %v845_v36 = vpack.c.bf16 %v843_v35, %v843_v35  ;;  %v846_v38 = vpack.c.bf16 %v844_v37, %v844_v37  ;;  %v1565_v37 = vld [vmem:[%s2111_s2 + $0xa] sm:$0x3] }
 0x326   : > { %851 = vrot.lane.b32.xlu1 %v845_v36, %s1696_s30  ;;  %848 = vrot.lane.b32.xlu0 %v845_v36, %s1695_s29  ;;  %v1130_v6 = vsel %vm299_vm1, %v845_v36, 0 }
 0x32a   : > { %859 = vrot.lane.b32.xlu1 %v846_v38, %s1695_s29  ;;  %853 = vrot.lane.b32.xlu0 %v846_v38, %s1696_s30  ;;  %s161_s29 = sand.u32 1, %s1685_s13  }
 0x32b   : > { %s1522_s30 = sshll.u32 %s161_s29, 3  ;;  %s1445_s20 = scalar_lea.sflag [#allocation3], %s161_s29 }
 0x398   : > { %v852_v39 = vpop.permute.xlu1 %851  ;;  %v849_v40 = vpop.permute.xlu0 %848 }
 0x399   : > { %v858_v41 = vsel %vm217_vm0, %v849_v40, %v852_v39 }
 0x39a   : > { %868 = vrot.lane.b32.xlu1 %v858_v41, %s1699_s5  ;;  %v896_v44 = vsel %vm299_vm1, %v858_v41, 0 }
 0x39c   : > { %v854_v42 = vpop.permute.xlu0 %853  ;;  %v860_v46 = vpop.permute.xlu1 %859 }
 0x39d   : > { %v855_v43 = vsel %vm217_vm0, %v852_v39, %v854_v42  ;;  %v1964_v47 = vsel %vm225_vm3, %v849_v40, %v860_v46  ;;  %v1970_v48 = vsel %vm225_vm3, %v860_v46, %v854_v42 }
 0x39e   : > { %878 = vrot.lane.b32.xlu1 %v855_v43, %s1698_s4  ;;  %865 = vrot.lane.b32.xlu0 %v855_v43, %s1699_s5  ;;  %v1317_v25 = vsel %vm299_vm1, %v1964_v47, 0 }
 0x39f   : > { %1552 = vmatprep.subr.msk.bf16.mxu1 %vm299_vm1, %v855_v43 }
 0x3a0   : > { %916 = vmatpush1.bf16.msra.mxu1 %v896_v44 }
 0x3a2   : > { %1048 = vrot.lane.b32.xlu1 %v845_v36, %s1699_s5  ;;  %876 = vrot.lane.b32.xlu0 %v858_v41, %s1698_s4 }
 0x3a3   : > { %1553 = vmatmul.mubr.msk.bf16.vlgmr.msra.gmra.mxu1 %vm295_vm2, %v1551_v45 }
 0x3a4   : > { %1035 = vmatprep.mubr.bf16.mxu1 %v1697_v4 }
 0x3a6   : > { %1058 = vrot.lane.b32.xlu1 %v846_v38, %s1698_s4  ;;  %1046 = vrot.lane.b32.xlu0 %v846_v38, %s1699_s5 }
 0x3aa   : > { %1235 = vrot.lane.b32.xlu1 %v1964_v47, %s1699_s5  ;;  %1056 = vrot.lane.b32.xlu0 %v845_v36, %s1698_s4 }
 0x3ae   : > { %1245 = vrot.lane.b32.xlu1 %v1970_v48, %s1698_s4  ;;  %1233 = vrot.lane.b32.xlu0 %v1970_v48, %s1699_s5  ;;  %s163_s5 = scalar_lea.vmem [#allocation2], %s1522_s30 }
 0x3af   : > { %s1459_s10 = sshll.u32 %s163_s5, 4  ;;  %s1460_s10 = int_to_ptr.vmem [resolvable:$true] %s1459_s10 }
 0x3b0   : > { %s1633_s24 = scalar_lea.vmem %s1460_s10, 128  ;;  %p1640_p0 = scmp.lt.s32.totalorder %s1460_s10, %s1638_s26 }
 0x3b1   : > { %p1634_p11 = scmp.ne.s32.totalorder %s1460_s10, %s1633_s24 }
 0x3b2   : > { %1243 = vrot.lane.b32.xlu0 %v1964_v47, %s1698_s4  ;;  %s1583_s4 = sshll.u32 %s1742_s16, 7  ;;  %s1639_s16 = scalar_lea.vmem %s1638_s26, 256 }
 0x3b3   : > { %s1457_s19 = scalar_lea.hbm %s2112_s3, %s1583_s4  ;;  %p1635_p12 = pnand %p1634_p11, %p1759_p5 }
 0x3b4   : > { %p1641_p1 = scmp.lt.s32.totalorder %s1639_s16, %s1633_s24 }
 0x3b5   : > { %p1636_p13 = pneg %p1635_p12 }
 0x3b6   : > { %p1642_p2 = por %p1641_p1, %p1640_p0 }
 0x3b8   : > { %p1643_p3 = pnand %p1642_p2, %p1636_p13 }
 0x40c   : > { %v869_v49 = vpop.permute.xlu1 %868 }
 0x410   : > { %v879_v50 = vpop.permute.xlu1 %878  ;;  %v866_v51 = vpop.permute.xlu0 %865 }
 0x411   : > { %v870_v54 = vsel %vm236_vm10, %v869_v49, %v866_v51  ;;  %v874_v55 = vsel %vm236_vm10, %v866_v51, %v869_v49 }
 0x414   : > { %v1049_v52 = vpop.permute.xlu1 %1048  ;;  %v877_v53 = vpop.permute.xlu0 %876 }
 0x415   : > { %v880_v56 = vsel %vm248_vm11, %v877_v53, %v879_v50  ;;  %v884_v57 = vsel %vm248_vm11, %v879_v50, %v877_v53 }
 0x416   : > { %v886_v58 = vsel %vm270_vm15, %v880_v56, %v874_v55  ;;  %v888_v59 = vsel %vm288_vm12, %v874_v55, %v880_v56  ;;  %v887_v60 = vsel %vm271_vm13, %v884_v57, %v870_v54  ;;  %v889_v61 = vsel %vm289_vm14, %v870_v54, %v884_v57 }
 0x417   : > { %1554 = vmatprep.subr.msk.bf16.mxu0 %vm299_vm1, %v887_v60  ;;  %1557 = vmatprep.subr.msk.bf16.mxu1 %vm299_vm1, %v889_v61  ;;  %v946_v62 = vsel %vm299_vm1, %v886_v58, 0  ;;  %v998_v63 = vsel %vm299_vm1, %v888_v59, 0 }
 0x418   : > { %v1059_v1 = vpop.permute.xlu1 %1058  ;;  %966 = vmatpush1.bf16.msra.mxu0 %v946_v62  ;;  %v1047_v2 = vpop.permute.xlu0 %1046  ;;  %1018 = vmatpush1.bf16.msra.mxu1 %v998_v63 }
 0x419   : > { %1563 = vmatprep.subr.msk.bf16.mxu1 %vm299_vm1, %v846_v38  ;;  %v1050_v8 = vsel %vm236_vm10, %v1049_v52, %v1047_v2  ;;  %v1054_v9 = vsel %vm236_vm10, %v1047_v2, %v1049_v52  ;;  %v1574_v38 = vld [vmem:[%s2111_s2 + $0x10] sm:$0x3] }
 0x41b   : > { %1555 = vmatmul.mubr.msk.bf16.vlgmr.msra.gmra.mxu0 %vm295_vm2, %v890_v3  ;;  %1558 = vmatmul.mubr.msk.bf16.vlgmr.msra.gmra.mxu1 %vm295_vm2, %v1556_v5 }
 0x41c   : > { %v1057_v7 = vpop.permute.xlu0 %1056  ;;  %1150 = vmatpush1.bf16.msra.mxu1 %v1130_v6  ;;  %1113 = vmatprep.mubr.bf16.mxu0 %v1697_v4  ;;  %v1236_v12 = vpop.permute.xlu1 %1235 }
 0x41d   : > { %v1060_v10 = vsel %vm248_vm11, %v1057_v7, %v1059_v1  ;;  %v1064_v11 = vsel %vm248_vm11, %v1059_v1, %v1057_v7  ;;  %1167 = vmatprep.mubr.bf16.mxu1 %v1697_v4 }
 0x41e   : > { %v1066_v13 = vsel %vm270_vm15, %v1060_v10, %v1054_v9  ;;  %v1067_v15 = vsel %vm271_vm13, %v1064_v11, %v1050_v8  ;;  %v1068_v17 = vsel %vm288_vm12, %v1054_v9, %v1060_v10  ;;  %v1069_v19 = vsel %vm289_vm14, %v1050_v8, %v1064_v11 }
 0x41f   : > { %1560 = vmatprep.subr.msk.bf16.mxu0 %vm299_vm1, %v1067_v15  ;;  %v1076_v16 = vsel %vm299_vm1, %v1066_v13, 0  ;;  %v1184_v21 = vsel %vm299_vm1, %v1068_v17, 0 }
 0x420   : > { %1096 = vmatpush1.bf16.msra.mxu0 %v1076_v16  ;;  %v1234_v18 = vpop.permute.xlu0 %1233  ;;  %v1246_v22 = vpop.permute.xlu1 %1245 }
 0x421   : > { %1566 = vmatprep.subr.msk.bf16.mxu0 %vm299_vm1, %v1069_v19  ;;  %v1237_v23 = vsel %vm236_vm10, %v1236_v12, %v1234_v18  ;;  %v1241_v29 = vsel %vm236_vm10, %v1234_v18, %v1236_v12 }
 0x423   : > { %1561 = vmatmul.mubr.msk.bf16.vlgmr.msra.gmra.mxu0 %vm295_vm2, %v1559_v14  ;;  %1564 = vmatmul.mubr.msk.bf16.vlgmr.msra.gmra.mxu1 %vm295_vm2, %v1562_v20 }
 0x424   : > { %1204 = vmatpush1.bf16.msra.mxu0 %v1184_v21  ;;  %v1244_v24 = vpop.permute.xlu0 %1243  ;;  %1221 = vmatprep.mubr.bf16.mxu0 %v1697_v4 }
 0x425   : > { %v1247_v30 = vsel %vm248_vm11, %v1244_v24, %v1246_v22  ;;  %v1251_v31 = vsel %vm248_vm11, %v1246_v22, %v1244_v24  ;;  %1572 = vmatprep.subr.msk.bf16.mxu0 %vm299_vm1, %v1970_v48  ;;  %1300 = vmatprep.mubr.bf16.mxu1 %v1697_v4 }
 0x426   : > { %v1253_v32 = vsel %vm270_vm15, %v1247_v30, %v1241_v29  ;;  %v1254_v33 = vsel %vm271_vm13, %v1251_v31, %v1237_v23  ;;  %v1255_v35 = vsel %vm288_vm12, %v1241_v29, %v1247_v30  ;;  %v1256_v36 = vsel %vm289_vm14, %v1237_v23, %v1251_v31 }
 0x427   : > { %1569 = vmatprep.subr.msk.bf16.mxu1 %vm299_vm1, %v1254_v33  ;;  %v1263_v34 = vsel %vm299_vm1, %v1253_v32, 0  ;;  %v1370_v27 = vsel %vm299_vm1, %v1255_v35, 0 }
 0x428   : > { %1283 = vmatpush1.bf16.msra.mxu1 %v1263_v34 }
 0x429   : > { %1575 = vmatprep.subr.msk.bf16.mxu1 %vm299_vm1, %v1256_v36 }
 0x42b   : > { %1567 = vmatmul.mubr.msk.bf16.vlgmr.msra.gmra.mxu0 %vm295_vm2, %v1565_v37  ;;  %1570 = vmatmul.mubr.msk.bf16.vlgmr.msra.gmra.mxu1 %vm295_vm2, %v1568_v26 }
 0x42c   : > { %1336 = vmatpush1.bf16.msra.mxu0 %v1317_v25  ;;  %1390 = vmatpush1.bf16.msra.mxu1 %v1370_v27 }
 0x42d   : > { %1353 = vmatprep.mubr.bf16.mxu0 %v1697_v4  ;;  %1407 = vmatprep.mubr.bf16.mxu1 %v1697_v4 }
 0x433   : > { %1573 = vmatmul.mubr.msk.bf16.vlgmr.msra.gmra.mxu0 %vm295_vm2, %v1571_v28  ;;  %1576 = vmatmul.mubr.msk.bf16.vlgmr.msra.gmra.mxu1 %vm295_vm2, %v1574_v38 }
 0x463   : > { %v935_v39 = vpop.f32.mrf.mxu1 }
 0x465   : > { %v937_v40 = vpop.f32.mrf.mxu1 }
 0x467   : > { %v939_v41 = vpop.f32.mrf.mxu1 }
 0x469   : > { %v940_v42 = vpop.f32.mrf.mxu1 }
 0x4db   : > { %v985_v43 = vpop.f32.mrf.mxu0  ;;  %v1037_v44 = vpop.f32.mrf.mxu1 }
 0x4dc   : > { %v986_v50 = vadd.f32 %v985_v43, %v935_v39 }
 0x4dd   : > { %v987_v45 = vpop.f32.mrf.mxu0  ;;  %v1039_v4 = vpop.f32.mrf.mxu1 }
 0x4de   : > { %v988_v53 = vadd.f32 %v987_v45, %v937_v40  ;;  %v1044_v56 = vadd.f32 %v1037_v44, %v986_v50 }
 0x4df   : > { %v989_v46 = vpop.f32.mrf.mxu0  ;;  %v1041_v47 = vpop.f32.mrf.mxu1 }
 0x4e0   : > { %v1045_v59 = vadd.f32 %v1039_v4, %v988_v53 }
 0x4e1   : > { %v990_v48 = vpop.f32.mrf.mxu0  ;;  %v1042_v49 = vpop.f32.mrf.mxu1 }
 0x4e3   : > { %v1115_v51 = vpop.f32.mrf.mxu0  ;;  %v1169_v52 = vpop.f32.mrf.mxu1 }
 0x4e4   : > { %v1122_v60 = vadd.f32 %v1115_v51, %v1044_v56 }
 0x4e5   : > { %v1117_v54 = vpop.f32.mrf.mxu0  ;;  %v1171_v55 = vpop.f32.mrf.mxu1 }
 0x4e6   : > { %v1123_v63 = vadd.f32 %v1117_v54, %v1045_v59  ;;  %v1176_v3 = vadd.f32 %v1169_v52, %v1122_v60 }
 0x4e7   : > { %v1119_v57 = vpop.f32.mrf.mxu0  ;;  %v1173_v58 = vpop.f32.mrf.mxu1 }
 0x4e8   : > { %v1177_v7 = vadd.f32 %v1171_v55, %v1123_v63 }
 0x4e9   : > { %v1120_v61 = vpop.f32.mrf.mxu0  ;;  %v1174_v62 = vpop.f32.mrf.mxu1 }
 0x4eb   : > { %v1223_v1 = vpop.f32.mrf.mxu0  ;;  %v1302_v2 = vpop.f32.mrf.mxu1 }
 0x4ec   : > { %v1230_v8 = vadd.f32 %v1223_v1, %v1176_v3 }
 0x4ed   : > { %v1225_v5 = vpop.f32.mrf.mxu0  ;;  %v1304_v6 = vpop.f32.mrf.mxu1 }
 0x4ee   : > { %v1231_v11 = vadd.f32 %v1225_v5, %v1177_v7  ;;  %v1309_v15 = vadd.f32 %v1302_v2, %v1230_v8 }
 0x4ef   : > { %v1227_v9 = vpop.f32.mrf.mxu0  ;;  %v1306_v10 = vpop.f32.mrf.mxu1 }
 0x4f0   : > { %v1310_v18 = vadd.f32 %v1304_v6, %v1231_v11 }
 0x4f1   : > { %v1228_v12 = vpop.f32.mrf.mxu0  ;;  %v1307_v13 = vpop.f32.mrf.mxu1 }
 0x4f3   : > { %v1355_v16 = vpop.f32.mrf.mxu0  ;;  %v1409_v17 = vpop.f32.mrf.mxu1 }
 0x4f4   : > { %v1362_v19 = vadd.f32 %v1355_v16, %v1309_v15 }
 0x4f5   : > { %v1357_v14 = vpop.f32.mrf.mxu0  ;;  %v1411_v20 = vpop.f32.mrf.mxu1 }
 0x4f6   : > { %v1416_v21 = vadd.f32 %v1409_v17, %v1362_v19  ;;  %v1363_v22 = vadd.f32 %v1357_v14, %v1310_v18 }
 0x4f7   : > { %v1359_v23 = vpop.f32.mrf.mxu0  ;;  %v1413_v24 = vpop.f32.mrf.mxu1 }
 0x4f8   : > { %v1417_v29 = vadd.f32 %v1411_v20, %v1363_v22  ;;  %v1418_v32 = vsel %vm822_vm4, %v1416_v21, 0.0 }
 0x4f9   : > { %v1360_v30 = vpop.f32.mrf.mxu0  ;;  %v1414_v31 = vpop.f32.mrf.mxu1 }
 0x4fa   : > { %v1419_v33 = vsel %vm822_vm4, %v1417_v29, 0.0 }
 0x4fb   : > { %v1420_v34 = vadd.f32 %v1419_v33, %v1418_v32 }
 0x4fd   : > { %1421 = vadd.xlane.f32.xlu0 %v1420_v34 }
 0x586   : > { %v1422_v35 = vpop.xlane.xlu0 %1421 }
 0x587   : > { %v1423_v36 = vmul.f32 0.00390625, %v1422_v35 }
 0x589   : > { %v1424_v37 = vsub.f32 %v1416_v21, %v1423_v36  ;;  %v1425_v26 = vsub.f32 %v1417_v29, %v1423_v36 }
 0x58b   : > { %v1426_v25 = vmul.f32 %v1424_v37, %v1424_v37  ;;  %v1427_v27 = vmul.f32 %v1425_v26, %v1425_v26 }
 0x58d   : > { %v1428_v28 = vsel %vm822_vm4, %v1426_v25, 0.0  ;;  %v1429_v38 = vsel %vm822_vm4, %v1427_v27, 0.0 }
 0x58e   : > { %v1430_v39 = vadd.f32 %v1429_v38, %v1428_v28 }
 0x590   : > { %1431 = vadd.xlane.f32.xlu1 %v1430_v39 }
 0x619   : > { %v1432_v40 = vpop.xlane.xlu1 %1431 }
 0x61a   : > { %v1433_v41 = vmul.f32 0.00390625, %v1432_v40 }
 0x61c   : > { %v1434_v42 = vadd.f32 1e-05, %v1433_v41 }
 0x61e   : > { %1631 = vrsqrt.f32 %v1434_v42 }
 0x62b   : > { %v1632_v43 = vpop.eup %1631 }
 0x62c   : > { %v1436_v44 = vmul.f32 %v1632_v43, %v1424_v37  ;;  %v1437_v45 = vmul.f32 %v1632_v43, %v1425_v26 }
 0x62e   : > { %v1440_v4 = vcombine.low %v1436_v44, %v1437_v45 }
 0x630   : > { %v1442_v46 = vadd.f32 %v1440_v4, %v1774_v0 }
 0x632   : > { %1443 = vst [vmem:[%s163_s5] sm:$0xff] %v1442_v46 }
 0x633   : > { %1646 = shalt.err (!%p1643_p3)
}
 0x634   : > { %s1647_s27 = scalar_lea.hbm %s1457_s19, 128  ;;  %s1651_s7 = scalar_lea.hbm %s2112_s3, 256 }
 0x635   : > { %p1648_p4 = scmp.ne.s32.totalorder %s1457_s19, %s1647_s27  ;;  %p1652_p9 = scmp.lt.s32.totalorder %s1457_s19, %s2112_s3 }
 0x636   : > { %p1653_p10 = scmp.lt.s32.totalorder %s1651_s7, %s1647_s27 }
 0x637   : > { %p1649_p7 = pnand %p1648_p4, %p1759_p5 }
 0x638   : > { %p1654_p11 = por %p1653_p10, %p1652_p9 }
 0x639   : > { %p1650_p8 = pneg %p1649_p7 }
 0x63b   : > { %p1655_p12 = pnand %p1654_p11, %p1650_p8 }
 0x63d   : > { %1658 = shalt.err (!%p1655_p12)
}
 0x63e   : > { %1584 = dma.vmem_to_hbm [thread:$0]  (%p1759_p5), %s1460_s10, 128, %s1457_s19, %s1445_s20  }
 0x63f PF: > { %p1590_p13 = scmp.ge.s32.totalorder %s1693_s15, 2  ;;  %s1471_s29 = sand.u32 1, %s1681_s12  }
 0x640   : > { %s1472_s30 = scalar_lea.sflag [#allocation3], %s1471_s29 }
 0x641   : > { %p1587_p0 = pnand %p1590_p13, %p1763_p6 }
 0x643   : > { %p1588_p1 = pneg %p1587_p0 }
 0x645   : > { %1676 = dma.done.wait (%p1588_p1), %s1472_s30, 128  }
 0x646   : > { %1678 = vsyncadd (%p1588_p1), %s1472_s30, 4294967168  ;;  %p13_p2 = scmp.ge.s32.totalorder %s1746_s18, 4   ;;  %s2115_s12 = smov %s1685_s13 }
 0x647   : > { %s2116_s13 = smov %s1689_s14  ;;  %s2117_s14 = smov %s1757_s21 }
 0x648   : > { %s2118_s15 = smov %s1746_s18  ;;  %15 = sbr.rel (!%p13_p2) target bundleno = 3 (0x3), region = 83 }
 0x64d   :  { %1477 = vsyncpa [#allocation3], 1 }
 0x64e   :  { %1479 = vsyncpa [#allocation3 + $0x1], 1 }

</bundles_post_ra>
